<compile_context>
chip_gen: v5e
topology: v5e:2x2
jax: 0.10.0
libtpu: 0.0.40
codegen_flags: <defaults>
</compile_context>

<pallas_src>
import jax
import jax.numpy as jnp
from jax.experimental import pallas as pl
from jax.experimental.pallas import tpu as pltpu


# Conv geometry of the PyTorch module.
_K1, _S1, _P1 = 5, 5, 2      # conv1: Conv1d(1, C, k=5, stride=5, padding=2)
_K2, _S2 = 5, 4              # conv2: Conv1d(C, C, k=5, stride=4)
_K3, _S3 = 4, 2              # conv3: Conv1d(C, C, k=4, stride=2)
_K1P = 8                     # stage-1 taps zero-padded 5 -> 8 for the MXU


def _leaky(v):
    return jnp.where(v >= 0.0, v, 0.2 * v)      # LeakyReLU(negative_slope=0.2)


# ----------------------------------------------------------------------------
# Fused kernel: conv1..conv3 + 1x1 conv, one grid step = `tb` batch samples,
# batch folded into the matmul M dimension, all intermediates in VMEM.
# ----------------------------------------------------------------------------
def _make_fused_kernel(tb, c, l1):
    r2 = l1 // _S2                 # rows/sample for x2 and x3 sections (= 8)
    m1, m2 = tb * l1, tb * r2

    def kernel(p1_ref, w1_ref, w2_ref, w3_ref, w4_ref, bn_ref,
               o_ref, x1_ref, x2_ref):
        # Packed BN scale/shift rows: [s1, t1, s2, t2, s3, t3, s4, t4].
        s1, t1 = bn_ref[0:1, :], bn_ref[1:2, :]
        s2, t2 = bn_ref[2:3, :], bn_ref[3:4, :]
        s3, t3 = bn_ref[4:5, :], bn_ref[5:6, :]
        s4, t4 = bn_ref[6:7, :], bn_ref[7:8, :]

        # The im2col reads below run a few rows past the last sample's valid
        # region (those rows only feed outputs that are never kept); zero the
        # 8-row scratch tails so the over-read stays finite & deterministic.
        pad8 = jnp.zeros((8, c), jnp.float32)
        x1_ref[m1:m1 + 8, :] = pad8
        x2_ref[m2:m2 + 8, :] = pad8

        # ---- stage 1: Conv1d(1,C,k=5,s=5,p=2) -> LeakyReLU -> BN1 ----------
        # Single MXU dot, K = 8 (taps zero-padded in the wrapper).
        y1 = jnp.dot(p1_ref[...], w1_ref[...],
                     preferred_element_type=jnp.float32)
        x1 = _leaky(y1) * s1 + t1                                   # (m1, C)
        x1_ref[0:m1, :] = x1

        # ---- stage 2: Conv1d(C,C,k=5,s=4) -> LeakyReLU -> BN2 --------------
        # im2col: tap k of output row (b, j) is x1 row l1*b + 4*j + k, fetched
        # with a stride-4 sublane read; the 5 taps are lane-concatenated into
        # an (m2, 5C) patch and contracted in one K=80 matmul.  Per-sample the
        # result has r2=8 rows, of which the first l2=7 are valid.
        p2 = jnp.concatenate(
            [x1_ref[pl.ds(k, m2, stride=_S2), :] for k in range(_K2)], axis=-1)
        x2 = _leaky(jnp.dot(p2, w2_ref[...],
                            preferred_element_type=jnp.float32)) * s2 + t2
        x2_ref[0:m2, :] = x2

        # ---- stage 3: Conv1d(C,C,k=4,s=2) -> LeakyReLU -> BN3 --------------
        # Computed at unit stride over the 8-row x2 sections so the result
        # keeps the aligned 8-rows-per-sample layout; the true stride-2
        # outputs sit at even row offsets (0, 2) and are extracted in the
        # wrapper.  Tap k is a plain offset-k read; one K=64 matmul.
        p3 = jnp.concatenate(
            [x2_ref[k:k + m2, :] for k in range(_K3)], axis=-1)
        x3 = _leaky(jnp.dot(p3, w3_ref[...],
                            preferred_element_type=jnp.float32)) * s3 + t3

        # ---- stage 4: 1x1 conv over concat([x1,x2,x3]) -> LeakyReLU -> BN4 -
        # The 1x1 conv is row-wise, so apply it to each stage's rows directly;
        # no concat buffer / extra VMEM round trip is needed.
        w4 = w4_ref[...]
        z1 = _leaky(jnp.dot(x1, w4, preferred_element_type=jnp.float32)) * s4 + t4
        z2 = _leaky(jnp.dot(x2, w4, preferred_element_type=jnp.float32)) * s4 + t4
        z3 = _leaky(jnp.dot(x3, w4, preferred_element_type=jnp.float32)) * s4 + t4

        # Padded, fully 8-aligned output block: [x1 | x2 (+1 pad row) | x3
        # (interleaved with its off-stride rows)].
        o_ref[:, 0:l1, :] = z1.reshape(tb, l1, c)
        o_ref[:, l1:l1 + r2, :] = z2.reshape(tb, r2, c)
        o_ref[:, l1 + r2:l1 + 2 * r2, :] = z3.reshape(tb, r2, c)

    return kernel


def _pick_tb(b, max_tb):
    """Batch-tile size: large enough to amortize per-step pipeline overhead,
    but >= 2 grid steps when b >= 2 so both v7x TensorCores get work."""
    if b <= 1:
        return 1
    return min(max_tb, pl.cdiv(b, 2))


# ----------------------------------------------------------------------------
# Forward pass (single fused pallas_call)
# ----------------------------------------------------------------------------
def octree_key_conv(x_ncl, params, *, max_tb=256):
    """x_ncl: (B, 1, L) float32 (PyTorch NCL layout); params: prepare_params().
    Returns (B, L1+L2+L3, C) float32 — identical to the PyTorch forward output
    (which permutes to (B, L, C) at the end)."""
    b, cin, l = x_ncl.shape
    assert cin == 1
    c = params["w4"].shape[0]
    l1 = (l + 2 * _P1 - _K1) // _S1 + 1
    l2 = (l1 - _K2) // _S2 + 1
    l3 = (l2 - _K3) // _S3 + 1
    r2 = l1 // _S2
    # The kernel's aligned-row layout assumes the module's geometry (stride1 ==
    # kernel1, and an x1 length that keeps the x2/x3 sections 8-row aligned).
    # Holds for L = 160 (l1=32, l2=7, l3=2).
    assert _S1 == _K1 and l1 % (_S2 * 8) == 0 and l2 <= r2 and _S3 * l3 <= r2

    tb = _pick_tb(b, max_tb)
    b_pad = pl.cdiv(b, tb) * tb
    x = x_ncl[:, 0, :].astype(jnp.float32)
    if b_pad != b:
        x = jnp.pad(x, ((0, b_pad - b), (0, 0)))

    # Stage-1 im2col is a free reshape (stride == kernel); taps padded 5 -> 8.
    xpad = jnp.pad(x, ((0, 0), (_P1, _P1)))[:, :l1 * _K1]
    p1 = jnp.pad(xpad.reshape(b_pad, l1, _K1),
                 ((0, 0), (0, 0), (0, _K1P - _K1))).reshape(b_pad * l1, _K1P)

    kernel = _make_fused_kernel(tb, c, l1)
    vmem = pltpu.MemorySpace.VMEM
    lpad = l1 + 2 * r2                       # padded output rows per sample

    flops = 2 * b_pad * (l1 * _K1P * c + r2 * _K2 * c * c + r2 * _K3 * c * c
                         + lpad * c * c)
    bytes_accessed = 4 * (b_pad * l1 * _K1P + _K1P * c
                          + (_K2 + _K3 + 1) * c * c + 8 * c + b_pad * lpad * c)

    out = pl.pallas_call(
        kernel,
        out_shape=jax.ShapeDtypeStruct((b_pad, lpad, c), jnp.float32),
        grid=(b_pad // tb,),
        in_specs=[
            # stage-1 patches, batch folded into rows: (B_pad*l1, 8)
            pl.BlockSpec((tb * l1, _K1P), lambda i: (i, 0), memory_space=vmem),
            # weights (shared across grid steps)
            pl.BlockSpec((_K1P, c), lambda i: (0, 0), memory_space=vmem),
            pl.BlockSpec((_K2 * c, c), lambda i: (0, 0), memory_space=vmem),
            pl.BlockSpec((_K3 * c, c), lambda i: (0, 0), memory_space=vmem),
            pl.BlockSpec((c, c), lambda i: (0, 0), memory_space=vmem),
            # packed BN scale/shift: (8, C)
            pl.BlockSpec((8, c), lambda i: (0, 0), memory_space=vmem),
        ],
        out_specs=pl.BlockSpec((tb, lpad, c), lambda i: (i, 0, 0),
                               memory_space=vmem),
        scratch_shapes=[pltpu.VMEM((tb * l1 + 8, c), jnp.float32),   # x1
                        pltpu.VMEM((tb * r2 + 8, c), jnp.float32)],  # x2
        compiler_params=pltpu.CompilerParams(
            dimension_semantics=("parallel",)),
        cost_estimate=pl.CostEstimate(flops=flops, transcendentals=0,
                                      bytes_accessed=bytes_accessed),
    )(p1, params["w1"], params["w2"], params["w3"], params["w4"], params["bn"])

    # Gather the valid rows of the aligned padded layout:
    #   x1: rows [0, l1); x2: rows [l1, l1+l2); x3: rows l1+r2, l1+r2+2, ...
    res = jnp.concatenate(
        [out[:, :l1 + l2],
         out[:, l1 + r2:l1 + r2 + _S3 * l3:_S3]], axis=1)
    return res[:b]


# ----------------------------------------------------------------------------
# Parameter construction / one-time preparation
# ----------------------------------------------------------------------------
def make_params(key, channel):
    """Raw parameters in the layouts PyTorch stores them (Conv1d: (Cout,Cin,K))."""
    ks = jax.random.split(key, 8)

    def conv_w(k, cout, cin, ksz):
        bound = 1.0 / ((cin * ksz) ** 0.5)
        return jax.random.uniform(k, (cout, cin, ksz), jnp.float32, -bound, bound)

    def bn(k):
        kg, kb, km, kv = jax.random.split(k, 4)
        gamma = 1.0 + 0.1 * jax.random.normal(kg, (channel,), jnp.float32)
        beta = 0.1 * jax.random.normal(kb, (channel,), jnp.float32)
        mean = 0.1 * jax.random.normal(km, (channel,), jnp.float32)
        var = jax.random.uniform(kv, (channel,), jnp.float32, 0.5, 1.5)
        return (gamma, beta, mean, var)

    return {
        "w1": conv_w(ks[0], channel, 1, _K1),
        "w2": conv_w(ks[1], channel, channel, _K2),
        "w3": conv_w(ks[2], channel, channel, _K3),
        "w4": conv_w(ks[3], channel, channel, 1),
        "bn1": bn(ks[4]), "bn2": bn(ks[5]), "bn3": bn(ks[6]), "bn4": bn(ks[7]),
    }


def prepare_params(raw, eps=1e-5):
    """One-time prep (outside the jitted forward): fold BN running stats into
    per-channel scale/shift (packed into one (8, C) array) and pre-flatten the
    conv weights into the im2col layouts the kernel consumes."""
    def fold(bn):
        gamma, beta, mean, var = bn
        scale = gamma * jax.lax.rsqrt(var + eps)
        return scale, beta - mean * scale

    c = raw["w1"].shape[0]
    s1, t1 = fold(raw["bn1"])
    s2, t2 = fold(raw["bn2"])
    s3, t3 = fold(raw["bn3"])
    s4, t4 = fold(raw["bn4"])
    w1 = jnp.transpose(raw["w1"][:, 0, :], (1, 0))                  # (K1, C)
    w1 = jnp.pad(w1, ((0, _K1P - _K1), (0, 0)))                     # (8, C)
    w2 = jnp.transpose(raw["w2"], (2, 1, 0)).reshape(_K2 * c, c)    # (80, C)
    w3 = jnp.transpose(raw["w3"], (2, 1, 0)).reshape(_K3 * c, c)    # (64, C)
    w4 = jnp.transpose(raw["w4"][:, :, 0], (1, 0))                  # (C, C)
    bn = jnp.stack([s1, t1, s2, t2, s3, t3, s4, t4], axis=0)        # (8, C)
    return {"w1": w1.astype(jnp.float32), "w2": w2.astype(jnp.float32),
            "w3": w3.astype(jnp.float32), "w4": w4.astype(jnp.float32),
            "bn": bn.astype(jnp.float32)}


# ----------------------------------------------------------------------------
# Pure-JAX reference of the PyTorch forward (for numerical verification)
# ----------------------------------------------------------------------------
def reference_forward(x_ncl, raw, eps=1e-5):
    def stage(x_blc, w, bn, kernel, stride, padding):
        gamma, beta, mean, var = bn
        b, l, cin = x_blc.shape
        cout = w.shape[0]
        xp = jnp.pad(x_blc, ((0, 0), (padding, padding), (0, 0)))
        lout = (l + 2 * padding - kernel) // stride + 1
        cols = [xp[:, off: off + (lout - 1) * stride + 1: stride, :]
                for off in range(kernel)]
        patches = jnp.stack(cols, axis=2).reshape(b, lout, kernel * cin)
        w2d = jnp.transpose(w, (2, 1, 0)).reshape(kernel * cin, cout)
        y = jnp.einsum("blk,kc->blc", patches, w2d,
                       precision=jax.lax.Precision.HIGHEST)
        y = jnp.where(y >= 0.0, y, 0.2 * y)                 # LeakyReLU(0.2)
        scale = gamma * jax.lax.rsqrt(var + eps)            # BN (eval)
        shift = beta - mean * scale
        return y * scale + shift

    x = jnp.transpose(x_ncl, (0, 2, 1))
    x1 = stage(x, raw["w1"], raw["bn1"], _K1, _S1, _P1)
    x2 = stage(x1, raw["w2"], raw["bn2"], _K2, _S2, 0)
    x3 = stage(x2, raw["w3"], raw["bn3"], _K3, _S3, 0)
    xc = jnp.concatenate([x1, x2, x3], axis=1)
    return stage(xc, raw["w4"], raw["bn4"], 1, 1, 0)        # == permuted output


if __name__ == "__main__":
    B, C, L = 2, 16, 160          # small shapes consistent with the module
    key = jax.random.PRNGKey(0)
    kx, kp = jax.random.split(key)
    x = jax.random.normal(kx, (B, 1, L), jnp.float32)       # NCL PyTorch layout
    raw = make_params(kp, C)
    params = prepare_params(raw)

    fwd = jax.jit(octree_key_conv)
    out = jax.block_until_ready(fwd(x, params))

    # L1=32, L2=7, L3=2  ->  Ltot=41
    assert out.shape == (B, 41, C), out.shape
    assert bool(jnp.all(jnp.isfinite(out)))

    ref = jax.block_until_ready(jax.jit(reference_forward)(x, raw))
    err = float(jnp.max(jnp.abs(out - ref)))
    assert err < 1e-4, f"max abs error vs pure-JAX reference: {err}"

    print("KERNEL_OK")
</pallas_src>

<mosaic_0001>
module attributes {stable_mosaic.version = 11 : i64} {
  func.func @kernel(%arg0: i32, %arg1: memref<32x8xf32, #tpu.memory_space<vmem>>, %arg2: memref<8x16xf32, #tpu.memory_space<vmem>>, %arg3: memref<80x16xf32, #tpu.memory_space<vmem>>, %arg4: memref<64x16xf32, #tpu.memory_space<vmem>>, %arg5: memref<16x16xf32, #tpu.memory_space<vmem>>, %arg6: memref<8x16xf32, #tpu.memory_space<vmem>>, %arg7: memref<1x48x16xf32, #tpu.memory_space<vmem>>, %arg8: memref<40x16xf32, #tpu.memory_space<vmem>>, %arg9: memref<16x16xf32, #tpu.memory_space<vmem>>) attributes {dimension_semantics = [#tpu.dimension_semantics<parallel>], iteration_bounds = array<i64: 2>, scalar_prefetch = 0 : i64, scratch_operands = 2 : i64, tpu.core_type = #tpu.core_type<tc>, window_params = [{transform_indices = @transform_0, window_bounds = array<i64: 32, 8>}, {pipeline_mode = #tpu.pipeline_mode<synchronous>, transform_indices = @transform_1, window_bounds = array<i64: 8, 16>}, {pipeline_mode = #tpu.pipeline_mode<synchronous>, transform_indices = @transform_2, window_bounds = array<i64: 80, 16>}, {pipeline_mode = #tpu.pipeline_mode<synchronous>, transform_indices = @transform_3, window_bounds = array<i64: 64, 16>}, {pipeline_mode = #tpu.pipeline_mode<synchronous>, transform_indices = @transform_4, window_bounds = array<i64: 16, 16>}, {pipeline_mode = #tpu.pipeline_mode<synchronous>, transform_indices = @transform_5, window_bounds = array<i64: 8, 16>}, {transform_indices = @transform_6, window_bounds = array<i64: 1, 48, 16>}]} {
    %c0 = arith.constant 0 : index
    %c0_0 = arith.constant 0 : index
    %0 = vector.load %arg6[%c0, %c0_0] : memref<8x16xf32, #tpu.memory_space<vmem>>, vector<1x16xf32>
    %c1 = arith.constant 1 : index
    %c0_1 = arith.constant 0 : index
    %1 = vector.load %arg6[%c1, %c0_1] : memref<8x16xf32, #tpu.memory_space<vmem>>, vector<1x16xf32>
    %c2 = arith.constant 2 : index
    %c0_2 = arith.constant 0 : index
    %2 = vector.load %arg6[%c2, %c0_2] : memref<8x16xf32, #tpu.memory_space<vmem>>, vector<1x16xf32>
    %c3 = arith.constant 3 : index
    %c0_3 = arith.constant 0 : index
    %3 = vector.load %arg6[%c3, %c0_3] : memref<8x16xf32, #tpu.memory_space<vmem>>, vector<1x16xf32>
    %c4 = arith.constant 4 : index
    %c0_4 = arith.constant 0 : index
    %4 = vector.load %arg6[%c4, %c0_4] : memref<8x16xf32, #tpu.memory_space<vmem>>, vector<1x16xf32>
    %c5 = arith.constant 5 : index
    %c0_5 = arith.constant 0 : index
    %5 = vector.load %arg6[%c5, %c0_5] : memref<8x16xf32, #tpu.memory_space<vmem>>, vector<1x16xf32>
    %c6 = arith.constant 6 : index
    %c0_6 = arith.constant 0 : index
    %6 = vector.load %arg6[%c6, %c0_6] : memref<8x16xf32, #tpu.memory_space<vmem>>, vector<1x16xf32>
    %c7 = arith.constant 7 : index
    %c0_7 = arith.constant 0 : index
    %7 = vector.load %arg6[%c7, %c0_7] : memref<8x16xf32, #tpu.memory_space<vmem>>, vector<1x16xf32>
    %cst = arith.constant 0.000000e+00 : f32
    %8 = vector.broadcast %cst : f32 to vector<8x16xf32>
    %c32 = arith.constant 32 : index
    %c0_8 = arith.constant 0 : index
    %9 = vector.load %arg8[%c32, %c0_8] : memref<40x16xf32, #tpu.memory_space<vmem>>, vector<8x16xf32>
    tpu.vector_store %arg8[%c32, %c0_8], %8 {strides = array<i32>} : memref<40x16xf32, #tpu.memory_space<vmem>>, vector<8x16xf32>,
    %c8 = arith.constant 8 : index
    %c0_9 = arith.constant 0 : index
    %10 = vector.load %arg9[%c8, %c0_9] : memref<16x16xf32, #tpu.memory_space<vmem>>, vector<8x16xf32>
    tpu.vector_store %arg9[%c8, %c0_9], %8 {strides = array<i32>} : memref<16x16xf32, #tpu.memory_space<vmem>>, vector<8x16xf32>,
    %c0_10 = arith.constant 0 : index
    %c0_11 = arith.constant 0 : index
    %11 = vector.load %arg1[%c0_10, %c0_11] : memref<32x8xf32, #tpu.memory_space<vmem>>, vector<32x8xf32>
    %c0_12 = arith.constant 0 : index
    %c0_13 = arith.constant 0 : index
    %12 = vector.load %arg2[%c0_12, %c0_13] : memref<8x16xf32, #tpu.memory_space<vmem>>, vector<8x16xf32>
    %cst_14 = arith.constant dense<0.000000e+00> : vector<32x16xf32>
    %13 = tpu.matmul %11, %12, %cst_14 {dimension_numbers = #tpu.dot_dimension_numbers<[1], [0], [0], [1], [0, 0, 1, 1], [], []>} : vector<32x8xf32>, vector<8x16xf32>, vector<32x16xf32> -> vector<32x16xf32>
    %cst_15 = arith.constant 0.000000e+00 : f32
    %14 = vector.broadcast %cst_15 : f32 to vector<32x16xf32>
    %15 = arith.cmpf oge, %13, %14 : vector<32x16xf32>
    %cst_16 = arith.constant 2.000000e-01 : f32
    %16 = vector.broadcast %cst_16 : f32 to vector<32x16xf32>
    %17 = arith.mulf %16, %13 : vector<32x16xf32>
    %18 = arith.select %15, %13, %17 : vector<32x16xi1>, vector<32x16xf32>
    %19 = vector.broadcast %0 : vector<1x16xf32> to vector<32x16xf32>
    %20 = arith.mulf %18, %19 : vector<32x16xf32>
    %21 = vector.broadcast %1 : vector<1x16xf32> to vector<32x16xf32>
    %22 = arith.addf %20, %21 : vector<32x16xf32>
    %c0_17 = arith.constant 0 : index
    %c0_18 = arith.constant 0 : index
    %23 = vector.load %arg8[%c0_17, %c0_18] : memref<40x16xf32, #tpu.memory_space<vmem>>, vector<32x16xf32>
    tpu.vector_store %arg8[%c0_17, %c0_18], %22 {strides = array<i32>} : memref<40x16xf32, #tpu.memory_space<vmem>>, vector<32x16xf32>,
    %c0_19 = arith.constant 0 : index
    %c0_20 = arith.constant 0 : index
    %24 = tpu.strided_load %arg8[%c0_19, %c0_20] {strides = array<i32: 4, 1>} : memref<40x16xf32, #tpu.memory_space<vmem>>, vector<8x16xf32>
    %c1_21 = arith.constant 1 : index
    %c0_22 = arith.constant 0 : index
    %25 = tpu.strided_load %arg8[%c1_21, %c0_22] {strides = array<i32: 4, 1>} : memref<40x16xf32, #tpu.memory_space<vmem>>, vector<8x16xf32>
    %c2_23 = arith.constant 2 : index
    %c0_24 = arith.constant 0 : index
    %26 = tpu.strided_load %arg8[%c2_23, %c0_24] {strides = array<i32: 4, 1>} : memref<40x16xf32, #tpu.memory_space<vmem>>, vector<8x16xf32>
    %c3_25 = arith.constant 3 : index
    %c0_26 = arith.constant 0 : index
    %27 = tpu.strided_load %arg8[%c3_25, %c0_26] {strides = array<i32: 4, 1>} : memref<40x16xf32, #tpu.memory_space<vmem>>, vector<8x16xf32>
    %c4_27 = arith.constant 4 : index
    %c0_28 = arith.constant 0 : index
    %28 = tpu.strided_load %arg8[%c4_27, %c0_28] {strides = array<i32: 4, 1>} : memref<40x16xf32, #tpu.memory_space<vmem>>, vector<8x16xf32>
    %29 = tpu.concatenate %24, %25, %26, %27, %28 in 1 : vector<8x16xf32>, vector<8x16xf32>, vector<8x16xf32>, vector<8x16xf32>, vector<8x16xf32> -> vector<8x80xf32>
    %c0_29 = arith.constant 0 : index
    %c0_30 = arith.constant 0 : index
    %30 = vector.load %arg3[%c0_29, %c0_30] : memref<80x16xf32, #tpu.memory_space<vmem>>, vector<80x16xf32>
    %cst_31 = arith.constant dense<0.000000e+00> : vector<8x16xf32>
    %31 = tpu.matmul %29, %30, %cst_31 {dimension_numbers = #tpu.dot_dimension_numbers<[1], [0], [0], [1], [0, 0, 1, 1], [], []>} : vector<8x80xf32>, vector<80x16xf32>, vector<8x16xf32> -> vector<8x16xf32>
    %cst_32 = arith.constant 0.000000e+00 : f32
    %32 = vector.broadcast %cst_32 : f32 to vector<8x16xf32>
    %33 = arith.cmpf oge, %31, %32 : vector<8x16xf32>
    %cst_33 = arith.constant 2.000000e-01 : f32
    %34 = vector.broadcast %cst_33 : f32 to vector<8x16xf32>
    %35 = arith.mulf %34, %31 : vector<8x16xf32>
    %36 = arith.select %33, %31, %35 : vector<8x16xi1>, vector<8x16xf32>
    %37 = vector.broadcast %2 : vector<1x16xf32> to vector<8x16xf32>
    %38 = arith.mulf %36, %37 : vector<8x16xf32>
    %39 = vector.broadcast %3 : vector<1x16xf32> to vector<8x16xf32>
    %40 = arith.addf %38, %39 : vector<8x16xf32>
    %c0_34 = arith.constant 0 : index
    %c0_35 = arith.constant 0 : index
    %41 = vector.load %arg9[%c0_34, %c0_35] : memref<16x16xf32, #tpu.memory_space<vmem>>, vector<8x16xf32>
    tpu.vector_store %arg9[%c0_34, %c0_35], %40 {strides = array<i32>} : memref<16x16xf32, #tpu.memory_space<vmem>>, vector<8x16xf32>,
    %c0_36 = arith.constant 0 : index
    %c0_37 = arith.constant 0 : index
    %42 = vector.load %arg9[%c0_36, %c0_37] : memref<16x16xf32, #tpu.memory_space<vmem>>, vector<8x16xf32>
    %c1_38 = arith.constant 1 : index
    %c0_39 = arith.constant 0 : index
    %43 = vector.load %arg9[%c1_38, %c0_39] : memref<16x16xf32, #tpu.memory_space<vmem>>, vector<8x16xf32>
    %c2_40 = arith.constant 2 : index
    %c0_41 = arith.constant 0 : index
    %44 = vector.load %arg9[%c2_40, %c0_41] : memref<16x16xf32, #tpu.memory_space<vmem>>, vector<8x16xf32>
    %c3_42 = arith.constant 3 : index
    %c0_43 = arith.constant 0 : index
    %45 = vector.load %arg9[%c3_42, %c0_43] : memref<16x16xf32, #tpu.memory_space<vmem>>, vector<8x16xf32>
    %46 = tpu.concatenate %42, %43, %44, %45 in 1 : vector<8x16xf32>, vector<8x16xf32>, vector<8x16xf32>, vector<8x16xf32> -> vector<8x64xf32>
    %c0_44 = arith.constant 0 : index
    %c0_45 = arith.constant 0 : index
    %47 = vector.load %arg4[%c0_44, %c0_45] : memref<64x16xf32, #tpu.memory_space<vmem>>, vector<64x16xf32>
    %cst_46 = arith.constant dense<0.000000e+00> : vector<8x16xf32>
    %48 = tpu.matmul %46, %47, %cst_46 {dimension_numbers = #tpu.dot_dimension_numbers<[1], [0], [0], [1], [0, 0, 1, 1], [], []>} : vector<8x64xf32>, vector<64x16xf32>, vector<8x16xf32> -> vector<8x16xf32>
    %cst_47 = arith.constant 0.000000e+00 : f32
    %49 = vector.broadcast %cst_47 : f32 to vector<8x16xf32>
    %50 = arith.cmpf oge, %48, %49 : vector<8x16xf32>
    %cst_48 = arith.constant 2.000000e-01 : f32
    %51 = vector.broadcast %cst_48 : f32 to vector<8x16xf32>
    %52 = arith.mulf %51, %48 : vector<8x16xf32>
    %53 = arith.select %50, %48, %52 : vector<8x16xi1>, vector<8x16xf32>
    %54 = vector.broadcast %4 : vector<1x16xf32> to vector<8x16xf32>
    %55 = arith.mulf %53, %54 : vector<8x16xf32>
    %56 = vector.broadcast %5 : vector<1x16xf32> to vector<8x16xf32>
    %57 = arith.addf %55, %56 : vector<8x16xf32>
    %c0_49 = arith.constant 0 : index
    %c0_50 = arith.constant 0 : index
    %58 = vector.load %arg5[%c0_49, %c0_50] : memref<16x16xf32, #tpu.memory_space<vmem>>, vector<16x16xf32>
    %cst_51 = arith.constant dense<0.000000e+00> : vector<32x16xf32>
    %59 = tpu.matmul %22, %58, %cst_51 {dimension_numbers = #tpu.dot_dimension_numbers<[1], [0], [0], [1], [0, 0, 1, 1], [], []>} : vector<32x16xf32>, vector<16x16xf32>, vector<32x16xf32> -> vector<32x16xf32>
    %cst_52 = arith.constant 0.000000e+00 : f32
    %60 = vector.broadcast %cst_52 : f32 to vector<32x16xf32>
    %61 = arith.cmpf oge, %59, %60 : vector<32x16xf32>
    %cst_53 = arith.constant 2.000000e-01 : f32
    %62 = vector.broadcast %cst_53 : f32 to vector<32x16xf32>
    %63 = arith.mulf %62, %59 : vector<32x16xf32>
    %64 = arith.select %61, %59, %63 : vector<32x16xi1>, vector<32x16xf32>
    %65 = vector.broadcast %6 : vector<1x16xf32> to vector<32x16xf32>
    %66 = arith.mulf %64, %65 : vector<32x16xf32>
    %67 = vector.broadcast %7 : vector<1x16xf32> to vector<32x16xf32>
    %68 = arith.addf %66, %67 : vector<32x16xf32>
    %cst_54 = arith.constant dense<0.000000e+00> : vector<8x16xf32>
    %69 = tpu.matmul %40, %58, %cst_54 {dimension_numbers = #tpu.dot_dimension_numbers<[1], [0], [0], [1], [0, 0, 1, 1], [], []>} : vector<8x16xf32>, vector<16x16xf32>, vector<8x16xf32> -> vector<8x16xf32>
    %cst_55 = arith.constant 0.000000e+00 : f32
    %70 = vector.broadcast %cst_55 : f32 to vector<8x16xf32>
    %71 = arith.cmpf oge, %69, %70 : vector<8x16xf32>
    %cst_56 = arith.constant 2.000000e-01 : f32
    %72 = vector.broadcast %cst_56 : f32 to vector<8x16xf32>
    %73 = arith.mulf %72, %69 : vector<8x16xf32>
    %74 = arith.select %71, %69, %73 : vector<8x16xi1>, vector<8x16xf32>
    %75 = vector.broadcast %6 : vector<1x16xf32> to vector<8x16xf32>
    %76 = arith.mulf %74, %75 : vector<8x16xf32>
    %77 = vector.broadcast %7 : vector<1x16xf32> to vector<8x16xf32>
    %78 = arith.addf %76, %77 : vector<8x16xf32>
    %cst_57 = arith.constant dense<0.000000e+00> : vector<8x16xf32>
    %79 = tpu.matmul %57, %58, %cst_57 {dimension_numbers = #tpu.dot_dimension_numbers<[1], [0], [0], [1], [0, 0, 1, 1], [], []>} : vector<8x16xf32>, vector<16x16xf32>, vector<8x16xf32> -> vector<8x16xf32>
    %cst_58 = arith.constant 0.000000e+00 : f32
    %80 = vector.broadcast %cst_58 : f32 to vector<8x16xf32>
    %81 = arith.cmpf oge, %79, %80 : vector<8x16xf32>
    %cst_59 = arith.constant 2.000000e-01 : f32
    %82 = vector.broadcast %cst_59 : f32 to vector<8x16xf32>
    %83 = arith.mulf %82, %79 : vector<8x16xf32>
    %84 = arith.select %81, %79, %83 : vector<8x16xi1>, vector<8x16xf32>
    %85 = vector.broadcast %6 : vector<1x16xf32> to vector<8x16xf32>
    %86 = arith.mulf %84, %85 : vector<8x16xf32>
    %87 = vector.broadcast %7 : vector<1x16xf32> to vector<8x16xf32>
    %88 = arith.addf %86, %87 : vector<8x16xf32>
    %89 = vector.shape_cast %68 : vector<32x16xf32> to vector<1x32x16xf32>
    %c0_60 = arith.constant 0 : index
    %c0_61 = arith.constant 0 : index
    %c0_62 = arith.constant 0 : index
    %90 = vector.load %arg7[%c0_60, %c0_61, %c0_62] : memref<1x48x16xf32, #tpu.memory_space<vmem>>, vector<1x32x16xf32>
    tpu.vector_store %arg7[%c0_60, %c0_61, %c0_62], %89 {strides = array<i32>} : memref<1x48x16xf32, #tpu.memory_space<vmem>>, vector<1x32x16xf32>,
    %91 = vector.shape_cast %78 : vector<8x16xf32> to vector<1x8x16xf32>
    %c0_63 = arith.constant 0 : index
    %c32_64 = arith.constant 32 : index
    %c0_65 = arith.constant 0 : index
    %92 = vector.load %arg7[%c0_63, %c32_64, %c0_65] : memref<1x48x16xf32, #tpu.memory_space<vmem>>, vector<1x8x16xf32>
    tpu.vector_store %arg7[%c0_63, %c32_64, %c0_65], %91 {strides = array<i32>} : memref<1x48x16xf32, #tpu.memory_space<vmem>>, vector<1x8x16xf32>,
    %93 = vector.shape_cast %88 : vector<8x16xf32> to vector<1x8x16xf32>
    %c0_66 = arith.constant 0 : index
    %c40 = arith.constant 40 : index
    %c0_67 = arith.constant 0 : index
    %94 = vector.load %arg7[%c0_66, %c40, %c0_67] : memref<1x48x16xf32, #tpu.memory_space<vmem>>, vector<1x8x16xf32>
    tpu.vector_store %arg7[%c0_66, %c40, %c0_67], %93 {strides = array<i32>} : memref<1x48x16xf32, #tpu.memory_space<vmem>>, vector<1x8x16xf32>,
    return
  }
  func.func @transform_0(%arg0: i32) -> (i32, i32) {
    %c0_i32 = arith.constant 0 : i32
    %c0_i32_0 = arith.constant 0 : i32
    return %arg0, %c0_i32 : i32, i32
  }
  func.func @transform_1(%arg0: i32) -> (i32, i32) {
    %c0_i32 = arith.constant 0 : i32
    %c0_i32_0 = arith.constant 0 : i32
    %c0_i32_1 = arith.constant 0 : i32
    return %c0_i32, %c0_i32_0 : i32, i32
  }
  func.func @transform_2(%arg0: i32) -> (i32, i32) {
    %c0_i32 = arith.constant 0 : i32
    %c0_i32_0 = arith.constant 0 : i32
    %c0_i32_1 = arith.constant 0 : i32
    return %c0_i32, %c0_i32_0 : i32, i32
  }
  func.func @transform_3(%arg0: i32) -> (i32, i32) {
    %c0_i32 = arith.constant 0 : i32
    %c0_i32_0 = arith.constant 0 : i32
    %c0_i32_1 = arith.constant 0 : i32
    return %c0_i32, %c0_i32_0 : i32, i32
  }
  func.func @transform_4(%arg0: i32) -> (i32, i32) {
    %c0_i32 = arith.constant 0 : i32
    %c0_i32_0 = arith.constant 0 : i32
    %c0_i32_1 = arith.constant 0 : i32
    return %c0_i32, %c0_i32_0 : i32, i32
  }
  func.func @transform_5(%arg0: i32) -> (i32, i32) {
    %c0_i32 = arith.constant 0 : i32
    %c0_i32_0 = arith.constant 0 : i32
    %c0_i32_1 = arith.constant 0 : i32
    return %c0_i32, %c0_i32_0 : i32, i32
  }
  func.func @transform_6(%arg0: i32) -> (i32, i32, i32) {
    %c0_i32 = arith.constant 0 : i32
    %c0_i32_0 = arith.constant 0 : i32
    %c0_i32_1 = arith.constant 0 : i32
    return %arg0, %c0_i32, %c0_i32_0 : i32, i32, i32
  }
}

</mosaic_0001>

<bundles_post_ra>
// kernel: octree_key_conv.1
= control target key start
LH: loop header
LB: loop body
LE: loop exit
PB: predicated region body
PF: predicated region fallthrough
CT: control target
= control target key end

     0   :  { %s743_s21 = smov 0   ;;  %s919_s0 = inlined_call_operand.vmem [shape: f32[64,8], index: 0, kind: input, shape index: {}]   ;;  %s920_s1 = inlined_call_operand.vmem [shape: f32[8,16], index: 1, kind: input, shape index: {}]   ;;  %s921_s2 = inlined_call_operand.vmem [shape: f32[80,16], index: 2, kind: input, shape index: {}]   ;;  %s922_s3 = inlined_call_operand.vmem [shape: f32[64,16], index: 3, kind: input, shape index: {}]   ;;  %s923_s4 = inlined_call_operand.vmem [shape: f32[16,16], index: 4, kind: input, shape index: {}]   ;;  %s924_s5 = inlined_call_operand.vmem [shape: f32[8,16], index: 5, kind: input, shape index: {}]   ;;  %s925_s6 = inlined_call_operand.vmem [shape: f32[2,48,16], index: 6, kind: output, shape index: {}]  }
   0x1 LB: > { %s749_s22 = sadd.s32 4294967295, %s701_s21   ;;  %p655_p0 = scmp.ge.s32.totalorder %s701_s21, 1  ;;  %s701_s21 = sphi %s743_s21, %s16_s21  }
   0x2   : > { %p213_p1 = scmp.lt.s32.totalorder %s701_s21, 3 }
   0x4   : > { %p214_p2 = pnand %p655_p0, %p213_p1 }
   0x5   : > { %s656_s25 = sshll.u32 (!%p214_p2), %s749_s22, 2  ;;  %s704_s14 = smov (!%p214_p2), 48  }
   0x6   : > { %217 = sbr.rel (%p214_p2) target bundleno = 836 (0x344), region = 44  ;;  %p244_p3 = scmp.lt.s32.totalorder (!%p214_p2), %s656_s25, 7 }
   0x7   : > { %s705_s15 = smov (!%p214_p2), 16   ;;  %s706_s16 = smov (!%p214_p2), 64  }
   0x8   : > { %s707_s17 = smov (!%p214_p2), 32   ;;  %p249_p4 = scmp.lt.s32.totalorder (!%p214_p2), %s749_s22, 1 }
   0xb   : > { %v269_v0 = vld [vmem:[%s920_s1] sm:$0xff]  ;;  %s927_s25 = smov (!%p244_p3, %s656_s25), 7  ;;  %vm270_vm0 = vcmask 64512   ;;  %v763_v5 = vld [vmem:[%s923_s4 + $0x8] sm:$0xff]  ;;  %vm262_vm1 = vcmask 130048   ;;  %v703_v9 = vmov 0.0  }
   0xc   : > { %298 = vmatpush.msra.mxu0 %v269_v0  ;;  %s657_s26 = sshll.u32 %s927_s25, 3  ;;  %v768_v6 = vld [vmem:[%s923_s4] sm:$0xff]  ;;  %497 = vmatpush.msra.mxu3 %v763_v5  ;;  %263 = vst.msk [vmem:[#allocation2 + $0x20] sm:$0xff] %vm262_vm1, %v703_v9  ;;  %v379_v34 = vld [vmem:[%s921_s2 + $0x48] sm:$0xff]  ;;  %v377_v36 = vld [vmem:[%s921_s2 + $0x38] sm:$0xff]  ;;  %s929_s22 = smov (!%p249_p4, %s749_s22), 1 }
   0xd   : > { %s247_s29 = scalar_lea.vmem %s919_s0, %s657_s26  ;;  %v687_v8 = vld [vmem:[%s924_s5] ss:$0 sm:$0xff]  ;;  %264 = vst.msk [vmem:[#allocation3 + $0x8] sm:$0xff] %vm262_vm1, %v703_v9  ;;  %v688_v11 = vld [vmem:[%s924_s5 + $0x1] ss:$0 sm:$0xff]  ;;  %390 = vmatpush.msra.mxu1 %v379_v34  ;;  %v376_v37 = vld [vmem:[%s921_s2 + $0x30] sm:$0xff] }
   0xe   : > { %v265_v1 = vld [vmem:[%s247_s29] sm:$0xff]  ;;  %v266_v2 = vld [vmem:[%s247_s29 + $0x8] sm:$0xff]  ;;  %v267_v3 = vld [vmem:[%s247_s29 + $0x10] sm:$0xff]  ;;  %498 = vmatpush.msra.mxu3 %v768_v6  ;;  %s673_s23 = smul.u32 48, %s929_s22  ;;  %vm364_vm9 = vcmask 261120   ;;  %vm366_vm10 = vcmask 392192  }
   0xf   : > { %659 = vmatmul.msk.f32.vlgmr.msra.gmra.mxu0 %vm270_vm0, %v265_v1  ;;  %v268_v4 = vld [vmem:[%s247_s29 + $0x18] sm:$0xff]  ;;  %v378_v35 = vld [vmem:[%s921_s2 + $0x40] sm:$0xff]  ;;  %v375_v38 = vld [vmem:[%s921_s2 + $0x28] sm:$0xff]  ;;  %vm368_vm11 = vcmask 523264   ;;  %vm380_vm12 = vcmask 654336  }
  0x10   : > { %391 = vmatpush.msra.mxu1 %v378_v35  ;;  %v374_v39 = vld [vmem:[%s921_s2 + $0x20] sm:$0xff]  ;;  %v373_v40 = vld [vmem:[%s921_s2 + $0x18] sm:$0xff]  ;;  %v372_v41 = vld [vmem:[%s921_s2 + $0x10] sm:$0xff]  ;;  %s839_s28 = scalar_lea.vmem %s925_s6, %s673_s23 }
  0x11   : > { %v371_v42 = vld [vmem:[%s921_s2 + $0x8] sm:$0xff]  ;;  %v370_v43 = vld [vmem:[%s921_s2] sm:$0xff] }
  0x12   : > { %392 = vmatpush.msra.mxu1 %v377_v36  ;;  %v828_v45 = vld [vmem:[%s924_s5 + $0x6] ss:$0 sm:$0xff]  ;;  %v833_v47 = vld [vmem:[%s924_s5 + $0x7] ss:$0 sm:$0xff] }
  0x14   : > { %393 = vmatpush.msra.mxu1 %v376_v37 }
  0x16   : > { %394 = vmatpush.msra.mxu1 %v375_v38 }
  0x17   : > { %660 = vmatmul.msk.f32.gmra.mxu0 %vm270_vm0, %v266_v2 }
  0x18   : > { %395 = vmatpush.msra.mxu1 %v374_v39  ;;  %v694_v39 = vld [vmem:[%s924_s5 + $0x5] ss:$0 sm:$0xff] }
  0x1a   : > { %396 = vmatpush.msra.mxu1 %v373_v40 }
  0x1c   : > { %397 = vmatpush.msra.mxu1 %v372_v41 }
  0x1e   : > { %398 = vmatpush.msra.mxu1 %v371_v42 }
  0x1f   : > { %661 = vmatmul.msk.f32.gmra.mxu0 %vm270_vm0, %v267_v3 }
  0x20   : > { %399 = vmatpush.msra.mxu1 %v370_v43 }
  0x22   : > { %579 = vmatpush.msrb.mxu1 %v763_v5 }
  0x24   : > { %580 = vmatpush.msrb.mxu1 %v768_v6 }
  0x27   : > { %662 = vmatmul.msk.f32.gmra.mxu0 %vm270_vm0, %v268_v4 }
  0x8c   : > { %v300_v7 = vpop.f32.mrf.mxu0 }
  0x8d   : > { %vm312_vm2 = vcmp.ge.f32.partialorder %v300_v7, 0.0  ;;  %v316_v10 = vmul.f32 0.2, %v300_v7 }
  0x8f   : > { %v320_v12 = vsel %vm312_vm2, %v300_v7, %v316_v10 }
  0x90   : > { %v325_v13 = vmul.f32 %v687_v8, %v320_v12 }
  0x92   : > { %v330_v14 = vadd.f32 %v688_v11, %v325_v13 }
  0x94   : > { %v303_v15 = vpop.f32.mrf.mxu0  ;;  %334 = vst.msk [vmem:[#allocation2] sm:$0xff] %vm262_vm1, %v330_v14  ;;  %665 = vmatmul.msk.f32.vlgmr.msra.gmra.mxu3 %vm262_vm1, %v330_v14  ;;  %v691_v14 = vld [vmem:[%s924_s5 + $0x2] ss:$0 sm:$0xff] }
  0x95   : > { %vm313_vm3 = vcmp.ge.f32.partialorder %v303_v15, 0.0  ;;  %v317_v16 = vmul.f32 0.2, %v303_v15 }
  0x97   : > { %v321_v17 = vsel %vm313_vm3, %v303_v15, %v317_v16  ;;  %v692_v16 = vld [vmem:[%s924_s5 + $0x3] ss:$0 sm:$0xff] }
  0x98   : > { %v326_v18 = vmul.f32 %v687_v8, %v321_v17 }
  0x9a   : > { %v331_v19 = vadd.f32 %v688_v11, %v326_v18 }
  0x9c   : > { %v306_v20 = vpop.f32.mrf.mxu0  ;;  %335 = vst.msk [vmem:[#allocation2 + $0x8] sm:$0xff] %vm262_vm1, %v331_v19  ;;  %666 = vmatmul.msk.f32.gmra.mxu3 %vm262_vm1, %v331_v19 }
  0x9d   : > { %vm314_vm4 = vcmp.ge.f32.partialorder %v306_v20, 0.0  ;;  %v318_v21 = vmul.f32 0.2, %v306_v20 }
  0x9f   : > { %v322_v22 = vsel %vm314_vm4, %v306_v20, %v318_v21 }
  0xa0   : > { %v327_v23 = vmul.f32 %v687_v8, %v322_v22 }
  0xa2   : > { %v332_v24 = vadd.f32 %v688_v11, %v327_v23  ;;  %v438_v23 = vld [vmem:[%s922_s3 + $0x38] sm:$0xff] }
  0xa3   : > { %450 = vmatpush.msra.mxu2 %v438_v23 }
  0xa4   : > { %v309_v25 = vpop.f32.mrf.mxu0  ;;  %336 = vst.msk [vmem:[#allocation2 + $0x10] sm:$0xff] %vm262_vm1, %v332_v24  ;;  %667 = vmatmul.msk.f32.gmra.mxu3 %vm262_vm1, %v332_v24  ;;  %v437_v24 = vld [vmem:[%s922_s3 + $0x30] sm:$0xff] }
  0xa5   : > { %vm315_vm5 = vcmp.ge.f32.partialorder %v309_v25, 0.0  ;;  %v319_v26 = vmul.f32 0.2, %v309_v25  ;;  %451 = vmatpush.msra.mxu2 %v437_v24 }
  0xa7   : > { %v323_v27 = vsel %vm315_vm5, %v309_v25, %v319_v26  ;;  %v436_v25 = vld [vmem:[%s922_s3 + $0x28] sm:$0xff]  ;;  %v435_v26 = vld [vmem:[%s922_s3 + $0x20] sm:$0xff] }
  0xa8   : > { %v328_v28 = vmul.f32 %v687_v8, %v323_v27  ;;  %452 = vmatpush.msra.mxu2 %v436_v25  ;;  %v434_v27 = vld [vmem:[%s922_s3 + $0x18] sm:$0xff] }
  0xaa   : > { %v333_v29 = vadd.f32 %v688_v11, %v328_v28  ;;  %453 = vmatpush.msra.mxu2 %v435_v26  ;;  %v433_v28 = vld [vmem:[%s922_s3 + $0x10] sm:$0xff] }
  0xac   : > { %337 = vst.msk [vmem:[#allocation2 + $0x18] sm:$0xff] %vm262_vm1, %v333_v29  ;;  %668 = vmatmul.msk.f32.gmra.mxu3 %vm262_vm1, %v333_v29  ;;  %454 = vmatpush.msra.mxu2 %v434_v27  ;;  %v432_v29 = vld [vmem:[%s922_s3 + $0x8] sm:$0xff] }
  0xae   : > { %455 = vmatpush.msra.mxu2 %v433_v28 }
  0xb0   : > { %456 = vmatpush.msra.mxu2 %v432_v29 }
  0xb3   : > { %v344_v30 = vld [vmem:[#allocation2 + $0x3] ss:$4 sm:$0xff]  ;;  %v340_v31 = vld [vmem:[#allocation2 + $0x1] ss:$4 sm:$0xff]  ;;  %v346_v32 = vld [vmem:[#allocation2 + $0x4] ss:$4 sm:$0xff] }
  0xb4   : > { %356 = vrot.lane.b32.xlu1 %v344_v30, %s704_s14  ;;  %348 = vrot.lane.b32.xlu0 %v340_v31, %s705_s15  ;;  %v342_v33 = vld [vmem:[#allocation2 + $0x2] ss:$4 sm:$0xff]  ;;  %v338_v62 = vld [vmem:[#allocation2] ss:$4 sm:$0xff] }
  0xb5   : > { %v431_v30 = vld [vmem:[%s922_s3] sm:$0xff] }
  0xb6   : > { %457 = vmatpush.msra.mxu2 %v431_v30 }
  0xb8   : > { %551 = vmatpush.msrb.mxu2 %v763_v5  ;;  %v693_v5 = vld [vmem:[%s924_s5 + $0x4] ss:$0 sm:$0xff] }
  0xba   : > { %552 = vmatpush.msrb.mxu2 %v768_v6 }
  0xbc   : > { %360 = vrot.lane.b32.xlu1 %v346_v32, %s706_s16  ;;  %352 = vrot.lane.b32.xlu0 %v342_v33, %s707_s17 }
 0x117   : > { %v500_v44 = vpop.f32.mrf.mxu3 }
 0x118   : > { %vm512_vm6 = vcmp.ge.f32.partialorder %v500_v44, 0.0  ;;  %v516_v46 = vmul.f32 0.2, %v500_v44 }
 0x11a   : > { %v520_v48 = vsel %vm512_vm6, %v500_v44, %v516_v46 }
 0x11b   : > { %v525_v49 = vmul.f32 %v828_v45, %v520_v48 }
 0x11d   : > { %v530_v50 = vadd.f32 %v833_v47, %v525_v49 }
 0x11f   : > { %590 = vst.msk [vmem:[%s839_s28] sm:$0xff] %vm262_vm1, %v530_v50  ;;  %v503_v51 = vpop.f32.mrf.mxu3 }
 0x120   : > { %vm513_vm7 = vcmp.ge.f32.partialorder %v503_v51, 0.0  ;;  %v517_v52 = vmul.f32 0.2, %v503_v51 }
 0x122   : > { %v521_v53 = vsel %vm513_vm7, %v503_v51, %v517_v52 }
 0x123   : > { %v526_v54 = vmul.f32 %v828_v45, %v521_v53 }
 0x125   : > { %v531_v55 = vadd.f32 %v833_v47, %v526_v54 }
 0x126   : > { %v357_v56 = vpop.permute.xlu1 %356  ;;  %v349_v57 = vpop.permute.xlu0 %348 }
 0x127   : > { %591 = vst.msk [vmem:[%s839_s28 + $0x8] sm:$0xff] %vm262_vm1, %v531_v55  ;;  %v506_v58 = vpop.f32.mrf.mxu3  ;;  %v363_v0 = vsel %vm262_vm1, %v338_v62, %v349_v57 }
 0x128   : > { %vm514_vm8 = vcmp.ge.f32.partialorder %v506_v58, 0.0  ;;  %v518_v59 = vmul.f32 0.2, %v506_v58 }
 0x12a   : > { %v522_v60 = vsel %vm514_vm8, %v506_v58, %v518_v59 }
 0x12b   : > { %v527_v61 = vmul.f32 %v828_v45, %v522_v60 }
 0x12d   : > { %v532_v63 = vadd.f32 %v833_v47, %v527_v61 }
 0x12e   : > { %v353_v1 = vpop.permute.xlu0 %352  ;;  %v361_v4 = vpop.permute.xlu1 %360 }
 0x12f   : > { %592 = vst.msk [vmem:[%s839_s28 + $0x10] sm:$0xff] %vm262_vm1, %v532_v63  ;;  %v365_v2 = vsel %vm364_vm9, %v363_v0, %v353_v1  ;;  %v509_v3 = vpop.f32.mrf.mxu3 }
 0x130   : > { %vm515_vm13 = vcmp.ge.f32.partialorder %v509_v3, 0.0  ;;  %v519_v7 = vmul.f32 0.2, %v509_v3  ;;  %v367_v8 = vsel %vm366_vm10, %v365_v2, %v357_v56 }
 0x131   : > { %v369_v9 = vsel %vm368_vm11, %v367_v8, %v361_v4 }
 0x132   : > { %v523_v10 = vsel %vm515_vm13, %v509_v3, %v519_v7  ;;  %663 = vmatmul.msk.f32.vlgmr.msra.gmra.mxu1 %vm380_vm12, %v369_v9 }
 0x133   : > { %v528_v11 = vmul.f32 %v828_v45, %v523_v10 }
 0x135   : > { %v533_v12 = vadd.f32 %v833_v47, %v528_v11 }
 0x137   : > { %593 = vst.msk [vmem:[%s839_s28 + $0x18] sm:$0xff] %vm262_vm1, %v533_v12 }
 0x1af   : > { %v401_v13 = vpop.f32.mrf.mxu1 }
 0x1b0   : > { %vm404_vm14 = vcmp.ge.f32.partialorder %v401_v13, 0.0  ;;  %v405_v15 = vmul.f32 0.2, %v401_v13 }
 0x1b2   : > { %v406_v17 = vsel %vm404_vm14, %v401_v13, %v405_v15 }
 0x1b3   : > { %v408_v18 = vmul.f32 %v691_v14, %v406_v17 }
 0x1b5   : > { %v410_v19 = vadd.f32 %v692_v16, %v408_v18 }
 0x1b7   : > { %411 = vst.msk [vmem:[#allocation3] sm:$0xff] %vm262_vm1, %v410_v19 }
 0x1be   : > { %v415_v20 = vld [vmem:[#allocation3 + $0x3] sm:$0xff] }
 0x1bf   : > { %v413_v21 = vld [vmem:[#allocation3 + $0x1] sm:$0xff]  ;;  %425 = vrot.lane.b32.xlu0 %v415_v20, %s704_s14 }
 0x1c0   : > { %417 = vrot.lane.b32.xlu2 %v413_v21, %s705_s15  ;;  %v414_v22 = vld [vmem:[#allocation3 + $0x2] sm:$0xff] }
 0x1c1   : > { %v412_v33 = vld [vmem:[#allocation3] sm:$0xff] }
 0x1c8   : > { %421 = vrot.lane.b32.xlu2 %v414_v22, %s707_s17 }
 0x21a   : > { %v418_v31 = vpop.permute.xlu2 %417 }
 0x21b   : > { %v428_v34 = vsel %vm262_vm1, %v412_v33, %v418_v31 }
 0x222   : > { %v422_v32 = vpop.permute.xlu2 %421 }
 0x223   : > { %v429_v35 = vsel %vm364_vm9, %v428_v34, %v422_v32 }
 0x231   : > { %v426_v36 = vpop.permute.xlu0 %425 }
 0x232   : > { %v430_v37 = vsel %vm366_vm10, %v429_v35, %v426_v36 }
 0x233   : > { %664 = vmatmul.msk.f32.vlgmr.msra.gmra.mxu2 %vm368_vm11, %v430_v37 }
 0x23b   : > { %669 = vmatmul.msk.f32.vlgmr.msrb.gmra.mxu2 %vm262_vm1, %v410_v19 }
 0x2b6   : > { %v459_v38 = vpop.f32.mrf.mxu2 }
 0x2b7   : > { %vm462_vm15 = vcmp.ge.f32.partialorder %v459_v38, 0.0  ;;  %v463_v6 = vmul.f32 0.2, %v459_v38 }
 0x2b9   : > { %v464_v40 = vsel %vm462_vm15, %v459_v38, %v463_v6 }
 0x2ba   : > { %v466_v41 = vmul.f32 %v693_v5, %v464_v40 }
 0x2bc   : > { %v468_v42 = vadd.f32 %v694_v39, %v466_v41 }
 0x2be   : > { %v554_v43 = vpop.f32.mrf.mxu2  ;;  %670 = vmatmul.msk.f32.vlgmr.msrb.gmra.mxu1 %vm262_vm1, %v468_v42 }
 0x2bf   : > { %vm557_vm0 = vcmp.ge.f32.partialorder %v554_v43, 0.0  ;;  %v558_v44 = vmul.f32 0.2, %v554_v43 }
 0x2c1   : > { %v559_v46 = vsel %vm557_vm0, %v554_v43, %v558_v44 }
 0x2c2   : > { %v560_v48 = vmul.f32 %v828_v45, %v559_v46 }
 0x2c4   : > { %v561_v49 = vadd.f32 %v833_v47, %v560_v48 }
 0x2c6   : > { %594 = vst.msk [vmem:[%s839_s28 + $0x20] sm:$0xff] %vm262_vm1, %v561_v49 }
 0x33b   : > { %v582_v50 = vpop.f32.mrf.mxu1 }
 0x33c   : > { %vm585_vm2 = vcmp.ge.f32.partialorder %v582_v50, 0.0  ;;  %v586_v51 = vmul.f32 0.2, %v582_v50 }
 0x33e   : > { %v587_v52 = vsel %vm585_vm2, %v582_v50, %v586_v51 }
 0x33f   : > { %v588_v53 = vmul.f32 %v828_v45, %v587_v52 }
 0x341   : > { %v589_v54 = vadd.f32 %v833_v47, %v588_v53 }
 0x343   : > { %595 = vst.msk [vmem:[%s839_s28 + $0x28] sm:$0xff] %vm262_vm1, %v589_v54 }
 0x344 PF: > { %s16_s21 = sadd.s32 1, %s701_s21  }
 0x345   : > { %p13_p5 = scmp.ge.s32.totalorder %s16_s21, 4  }
 0x347   :  { %15 = sbr.rel (!%p13_p5) target bundleno = 1 (0x1), region = 78 }

</bundles_post_ra>
